<compile_context>
chip_gen: v7x
topology: tpu7x:2x2x1
jax: 0.10.0
libtpu: 0.0.40
codegen_flags: <defaults>
</compile_context>

<pallas_src>
import jax
import jax.numpy as jnp
from jax.experimental import pallas as pl
from jax.experimental.pallas import tpu as pltpu


def _gates_kernel(w_ref, b_ref, x_ref, g_ref, out_ref):
    # w_ref  : VMEM (C, 1) f32  -- BN-folded conv weights (broadcast over lanes)
    # b_ref  : SMEM (1,)   f32  -- BN-folded bias
    # x_ref  : VMEM (1, C, t)
    # g_ref  : VMEM (1, C, t)
    # out_ref: VMEM (1, 2C, t)  -- rows [:C] = p1, rows [C:] = p2
    x = x_ref[0].astype(jnp.float32)              # (C, t)
    g = g_ref[0].astype(jnp.float32)              # (C, t)

    # 1x1 conv over channels: lane-wise FMA + cross-sublane reduce (XLU),
    # then the sigmoid on the EUP.  Broadcasts over the channel (sublane) axis.
    z = jnp.sum(w_ref[...] * g, axis=0, keepdims=True) + b_ref[0]   # (1, t)
    gl = jax.nn.sigmoid(z)

    p1 = (1.0 - gl) * x
    p2 = (1.0 + gl) * g
    # Single fused full-block store (one unmasked vst stream, no partial-sublane
    # masked stores even when C is not a multiple of the sublane tile).
    out_ref[0] = jnp.concatenate([p1, p2], axis=0).astype(out_ref.dtype)


def _vmem_capacity_bytes():
    try:
        cap = getattr(pltpu.get_tpu_info(), "vmem_capacity_bytes", None)
        if cap:
            return int(cap)
    except Exception:
        pass
    return 64 * 1024 * 1024   # conservative fallback: v7x per-TensorCore VMEM


def _pick_tile(HW, C, itemsize, t_target):
    """Lane-dense tile along H*W sized against a generation-aware VMEM budget."""
    vmem_cap = _vmem_capacity_bytes()
    budget = vmem_cap // 4                    # double-buffered working-set budget
    bytes_per_lane = 8 * C * itemsize         # 2 x (x tile + g tile + 2C out tile)
    t_cap = max(128, (budget // bytes_per_lane) // 128 * 128)
    t_max = min(t_cap, max(128, (t_target // 128) * 128))

    if HW <= t_max:
        return HW, vmem_cap                   # one full block (any HW is allowed)

    # Prefer a multiple of 128 in [t_max/2, t_max] that divides HW exactly:
    # no ragged tail, every block is full and unmasked.
    if HW % 128 == 0:
        for cand in range(t_max, max(127, t_max // 2 - 1), -128):
            if HW % cand == 0:
                return cand, vmem_cap

    # Otherwise use the aligned max tile; Pallas masks the ragged last block
    # (no host-side padding / slicing, no extra HBM traffic).
    return t_max, vmem_cap


def gates_block(x, g, conv_w, bn_gamma, bn_beta, bn_mean, bn_var,
                eps=1e-5, t_hw=65536):
    """x, g: (N, C, H, W).  conv_w: (1, C, 1, 1).  Returns (N, 2C, H, W)."""
    N, C, H, W = x.shape
    HW = H * W
    itemsize = jnp.dtype(x.dtype).itemsize

    # Fold eval-mode BatchNorm into the conv weight column and a scalar bias.
    # TODO(synk): training-mode BatchNorm (batch statistics over the conv output)
    # is not implemented; this is the inference fold using running stats.
    scale = (bn_gamma / jnp.sqrt(bn_var + eps)).astype(jnp.float32)     # (1,)
    bias = (bn_beta - bn_mean * scale).astype(jnp.float32)              # (1,)
    w_col = conv_w.reshape(C, 1).astype(jnp.float32) * scale            # (C, 1)

    t, vmem_cap = _pick_tile(HW, C, itemsize, t_hw)
    grid_j = pl.cdiv(HW, t)
    # Megacore balance: make sure both TensorCores (v7x) get at least one step.
    if N * grid_j < 2 and HW >= 256:
        t = 128 * pl.cdiv(pl.cdiv(HW, 2), 128)
        grid_j = pl.cdiv(HW, t)

    x3 = x.reshape(N, C, HW)
    g3 = g.reshape(N, C, HW)

    out = pl.pallas_call(
        _gates_kernel,
        out_shape=jax.ShapeDtypeStruct((N, 2 * C, HW), x.dtype),
        grid=(N, grid_j),
        in_specs=[
            pl.BlockSpec((C, 1), lambda n, j: (0, 0)),                  # folded weights (VMEM)
            pl.BlockSpec(memory_space=pltpu.MemorySpace.SMEM),          # folded bias
            pl.BlockSpec((1, C, t), lambda n, j: (n, 0, j)),            # x tile
            pl.BlockSpec((1, C, t), lambda n, j: (n, 0, j)),            # g tile
        ],
        out_specs=pl.BlockSpec((1, 2 * C, t), lambda n, j: (n, 0, j)),
        compiler_params=pltpu.CompilerParams(
            dimension_semantics=("parallel", "parallel"),
            vmem_limit_bytes=int(vmem_cap * 3 // 4)),
    )(w_col, bias, x3, g3)

    return out.reshape(N, 2 * C, H, W)


def _reference(x, g, conv_w, bn_gamma, bn_beta, bn_mean, bn_var, eps=1e-5):
    # Pure-JAX reference mirroring the PyTorch forward (NCHW, eval-mode BN).
    z = jnp.einsum("nchw,oc->nohw", g, conv_w.reshape(1, -1))        # (N,1,H,W)
    z = (z - bn_mean.reshape(1, 1, 1, 1)) / jnp.sqrt(bn_var.reshape(1, 1, 1, 1) + eps)
    z = z * bn_gamma.reshape(1, 1, 1, 1) + bn_beta.reshape(1, 1, 1, 1)
    gl = jax.nn.sigmoid(z)
    p1 = (1.0 - gl) * x
    p2 = (1.0 + gl) * g
    return jnp.concatenate([p1, p2], axis=1)


if __name__ == "__main__":
    N, C, H, W = 2, 4, 16, 16   # x_l = 4

    key = jax.random.PRNGKey(0)
    kx, kg, kw = jax.random.split(key, 3)
    x = jax.random.normal(kx, (N, C, H, W), dtype=jnp.float32)
    g = jax.random.normal(kg, (N, C, H, W), dtype=jnp.float32)

    # Conv2d(C, 1, kernel_size=1, bias=False) weight: (1, C, 1, 1)
    conv_w = jax.random.normal(kw, (1, C, 1, 1), dtype=jnp.float32) * 0.5
    # BatchNorm2d(1) deterministic (fresh-init, inference) parameters.
    bn_gamma = jnp.ones((1,), jnp.float32)
    bn_beta = jnp.zeros((1,), jnp.float32)
    bn_mean = jnp.zeros((1,), jnp.float32)
    bn_var = jnp.ones((1,), jnp.float32)

    out = gates_block(x, g, conv_w, bn_gamma, bn_beta, bn_mean, bn_var)
    out = jax.block_until_ready(out)

    ref = _reference(x, g, conv_w, bn_gamma, bn_beta, bn_mean, bn_var)
    assert out.shape == (N, 2 * C, H, W)
    assert jnp.allclose(out, ref, atol=1e-5, rtol=1e-5)

    print("KERNEL_OK")
</pallas_src>

<mosaic_0001>
module attributes {stable_mosaic.version = 11 : i64} {
  func.func @_gates_kernel(%arg0: i32, %arg1: i32, %arg2: memref<4x1xf32, #tpu.memory_space<vmem>>, %arg3: memref<1xf32, #tpu.memory_space<smem>>, %arg4: memref<1x4x256xf32, #tpu.memory_space<vmem>>, %arg5: memref<1x4x256xf32, #tpu.memory_space<vmem>>, %arg6: memref<1x8x256xf32, #tpu.memory_space<vmem>>) attributes {dimension_semantics = [#tpu.dimension_semantics<parallel>, #tpu.dimension_semantics<parallel>], iteration_bounds = array<i64: 2, 1>, scalar_prefetch = 0 : i64, scratch_operands = 0 : i64, tpu.core_type = #tpu.core_type<tc>, window_params = [{pipeline_mode = #tpu.pipeline_mode<synchronous>, transform_indices = @transform_0, window_bounds = array<i64: 4, 1>}, {transform_indices = @transform_1, window_bounds = array<i64: 1>}, {transform_indices = @transform_2, window_bounds = array<i64: 1, 4, 256>}, {transform_indices = @transform_3, window_bounds = array<i64: 1, 4, 256>}, {transform_indices = @transform_4, window_bounds = array<i64: 1, 8, 256>}]} {
    %c0 = arith.constant 0 : index
    %c0_0 = arith.constant 0 : index
    %c0_1 = arith.constant 0 : index
    %0 = vector.load %arg4[%c0, %c0_0, %c0_1] : memref<1x4x256xf32, #tpu.memory_space<vmem>>, vector<1x4x256xf32>
    %1 = vector.shape_cast %0 : vector<1x4x256xf32> to vector<4x256xf32>
    %c0_2 = arith.constant 0 : index
    %c0_3 = arith.constant 0 : index
    %c0_4 = arith.constant 0 : index
    %2 = vector.load %arg5[%c0_2, %c0_3, %c0_4] : memref<1x4x256xf32, #tpu.memory_space<vmem>>, vector<1x4x256xf32>
    %3 = vector.shape_cast %2 : vector<1x4x256xf32> to vector<4x256xf32>
    %c0_5 = arith.constant 0 : index
    %c0_6 = arith.constant 0 : index
    %4 = vector.load %arg2[%c0_5, %c0_6] : memref<4x1xf32, #tpu.memory_space<vmem>>, vector<4x1xf32>
    %5 = vector.broadcast %4 : vector<4x1xf32> to vector<4x256xf32>
    %6 = arith.mulf %5, %3 : vector<4x256xf32>
    %cst = arith.constant dense<0.000000e+00> : vector<256xf32>
    %7 = vector.multi_reduction <add>, %6, %cst [0] : vector<4x256xf32> to vector<256xf32>
    %8 = vector.shape_cast %7 : vector<256xf32> to vector<1x256xf32>
    %c0_7 = arith.constant 0 : index
    %9 = memref.load %arg3[%c0_7] : memref<1xf32, #tpu.memory_space<smem>>
    %10 = vector.broadcast %9 : f32 to vector<1x256xf32>
    %11 = arith.addf %8, %10 : vector<1x256xf32>
    %12 = arith.negf %11 : vector<1x256xf32>
    %13 = math.exp %12 : vector<1x256xf32>
    %cst_8 = arith.constant 1.000000e+00 : f32
    %14 = vector.broadcast %cst_8 : f32 to vector<1x256xf32>
    %15 = arith.addf %14, %13 : vector<1x256xf32>
    %16 = arith.divf %14, %15 : vector<1x256xf32>
    %cst_9 = arith.constant 1.000000e+00 : f32
    %17 = vector.broadcast %cst_9 : f32 to vector<1x256xf32>
    %18 = arith.subf %17, %16 : vector<1x256xf32>
    %19 = vector.broadcast %18 : vector<1x256xf32> to vector<4x256xf32>
    %20 = arith.mulf %19, %1 : vector<4x256xf32>
    %cst_10 = arith.constant 1.000000e+00 : f32
    %21 = vector.broadcast %cst_10 : f32 to vector<1x256xf32>
    %22 = arith.addf %21, %16 : vector<1x256xf32>
    %23 = vector.broadcast %22 : vector<1x256xf32> to vector<4x256xf32>
    %24 = arith.mulf %23, %3 : vector<4x256xf32>
    %25 = tpu.concatenate %20, %24 in 0 : vector<4x256xf32>, vector<4x256xf32> -> vector<8x256xf32>
    %c0_11 = arith.constant 0 : index
    %c0_12 = arith.constant 0 : index
    %c0_13 = arith.constant 0 : index
    %26 = vector.load %arg6[%c0_11, %c0_12, %c0_13] : memref<1x8x256xf32, #tpu.memory_space<vmem>>, vector<1x8x256xf32>
    %27 = vector.shape_cast %26 : vector<1x8x256xf32> to vector<8x256xf32>
    %28 = vector.shape_cast %25 : vector<8x256xf32> to vector<1x8x256xf32>
    tpu.vector_store %arg6[%c0_11, %c0_12, %c0_13], %28 {strides = array<i32>} : memref<1x8x256xf32, #tpu.memory_space<vmem>>, vector<1x8x256xf32>,
    return
  }
  func.func @transform_0(%arg0: i32, %arg1: i32) -> (i32, i32) {
    %c0_i32 = arith.constant 0 : i32
    %c0_i32_0 = arith.constant 0 : i32
    %c0_i32_1 = arith.constant 0 : i32
    return %c0_i32, %c0_i32_0 : i32, i32
  }
  func.func @transform_1(%arg0: i32, %arg1: i32) -> i32 {
    %c0_i32 = arith.constant 0 : i32
    %c0_i32_0 = arith.constant 0 : i32
    return %c0_i32 : i32
  }
  func.func @transform_2(%arg0: i32, %arg1: i32) -> (i32, i32, i32) {
    %c0_i32 = arith.constant 0 : i32
    %c0_i32_0 = arith.constant 0 : i32
    return %arg0, %c0_i32, %arg1 : i32, i32, i32
  }
  func.func @transform_3(%arg0: i32, %arg1: i32) -> (i32, i32, i32) {
    %c0_i32 = arith.constant 0 : i32
    %c0_i32_0 = arith.constant 0 : i32
    return %arg0, %c0_i32, %arg1 : i32, i32, i32
  }
  func.func @transform_4(%arg0: i32, %arg1: i32) -> (i32, i32, i32) {
    %c0_i32 = arith.constant 0 : i32
    %c0_i32_0 = arith.constant 0 : i32
    return %arg0, %c0_i32, %arg1 : i32, i32, i32
  }
}

</mosaic_0001>

<bundles_post_ra>
// kernel: tpu_custom_call.1
= control target key start
LH: loop header
LB: loop body
LE: loop exit
PB: predicated region body
PF: predicated region fallthrough
CT: control target
= control target key end

     0   :  { %s884_s0 = inlined_call_operand.vmem [shape: f32[4,1], index: 0, kind: input, shape index: {}]   ;;  %s885_s1 = inlined_call_operand.<no memory space> [shape: f32[1], index: 1, kind: input, shape index: {}]   ;;  %s886_s2 = inlined_call_operand.hbm [shape: f32[2,4,256], index: 2, kind: input, shape index: {}]   ;;  %s887_s3 = inlined_call_operand.vmem [shape: f32[2,4,256], index: 3, kind: input, shape index: {}]   ;;  %s888_s4 = inlined_call_operand.hbm [shape: f32[2,8,256], index: 4, kind: output, shape index: {}]  }
   0x1   :  { %9 = sst [smem:[#allocation2]] %s885_s1 }
   0x2   :  { %10 = vsyncpa [#allocation4], 0 }
   0x3   :  { %12 = vsyncpa [#allocation4 + $0x1], 0 }
   0x4   :  { %13 = vsyncpa [#allocation5], 0 }
   0x5   :  { %15 = vsyncpa [#allocation5 + $0x1], 0  ;;  %s696_s17 = smov 0   ;;  %s698_s18 = smov 0  }
   0x6   :  { %s700_s19 = smov 0   ;;  %s702_s20 = smov 0  }
   0x7   :  { %s704_s21 = smov 0   ;;  %s706_s22 = smov 0  }
   0x8 LB: > { %s455_s1 = sadd.s32 4294967295, %s663_s22   ;;  %s456_s23 = sadd.s32 4294967294, %s663_s22   ;;  %s663_s22 = sphi %s706_s22, %s21_s22   ;;  %s659_s21 = sphi %s704_s21, %s904_s21   ;;  %s655_s20 = sphi %s702_s20, %s903_s20   ;;  %s651_s19 = sphi %s700_s19, %s902_s19   ;;  %s647_s18 = sphi %s698_s18, %s901_s18   ;;  %s643_s17 = sphi %s696_s17, %s900_s17  }
   0x9   : > { %s33_s24 = sadd.s32 1, %s659_s21  ;;  %s84_s25 = sadd.s32 1, %s651_s19 }
   0xa   : > { %p35_p0 = scmp.ge.s32.totalorder %s33_s24, 2  ;;  %p91_p1 = scmp.ne.s32.totalorder %s651_s19, %s647_s18 }
   0xb   : > { %p92_p2 = scmp.eq.s32.totalorder %s663_s22, 0  ;;  %p97_p3 = scmp.ne.s32.totalorder %s647_s18, %s643_s17 }
   0xc   : > { %s906_s24 = smov (%p35_p0, %s33_s24), 0  ;;  %p98_p5 = scmp.eq.s32.totalorder %s455_s1, 0 }
   0xd   : > { %p737_p4 = por %p92_p2, %p91_p1  ;;  %s79_s27 = ssub.s32 %s659_s21, %s906_s24 }
   0xe   : > { %p151_p6 = scmp.eq.s32.totalorder %s455_s1, 1  ;;  %p82_p7 = scmp.eq.s32.totalorder %s79_s27, 0 }
   0xf   : > { %p743_p8 = por %p98_p5, %p97_p3  ;;  %p157_p10 = scmp.eq.s32.totalorder %s456_s23, 1 }
  0x10   : > { %p747_p9 = por %p151_p6, %p91_p1  ;;  %p489_p13 = scmp.lt.s32.totalorder %s663_s22, 2 }
  0x11   : > { %s752_s30 = scalar_select %p82_p7, %s651_s19, %s84_s25  }
  0x12   : > { %s892_s29 = scalar_select %p747_p9, 1, 0 }
  0x13   : > { %p754_p11 = por %p157_p10, %p97_p3  ;;  %s183_s6 = sand.u32 1, %s651_s19  }
  0x14   : > { %s459_s7 = sshll.u32 %s183_s6, 3  ;;  %s474_s8 = sshll.u32 %s659_s21, 7 }
  0x15   : > { %s893_s5 = scalar_select %p754_p11, 1, 0 }
  0x16   : > { %s765_s11 = scalar_lea.hbm %s886_s2, %s474_s8  ;;  %s187_s12 = scalar_lea.vmem [#allocation3], %s459_s7 }
  0x17   : > { %s197_s13 = sshll.u32 %s187_s12, 4  ;;  %p771_p0 = pnand %p489_p13, %p737_p4  ;;  %s767_s13 = int_to_ptr.vmem [resolvable:$true] %s197_s13 }
  0x18   : > { %s184_s15 = scalar_lea.sflag [#allocation4], %s183_s6  ;;  %s551_s16 = scalar_lea.hbm %s765_s11, 128 }
  0x19   : > { %p552_p3 = scmp.ne.s32.totalorder %s765_s11, %s551_s16  ;;  %p553_p5 = pneg %p771_p0 }
  0x1a   : > { %s556_s25 = scalar_lea.hbm %s886_s2, 256  ;;  %p557_p4 = scmp.lt.u32.totalorder %s765_s11, %s886_s2 }
  0x1b   : > { %p554_p6 = pnand %p553_p5, %p552_p3  ;;  %p558_p10 = scmp.lt.u32.totalorder %s556_s25, %s551_s16 }
  0x1c   : > { %p560_p12 = scmp.lt.u32.totalorder %s551_s16, %s765_s11 }
  0x1d   : > { %p555_p7 = pneg %p554_p6  ;;  %p559_p13 = por %p558_p10, %p557_p4 }
  0x1f   : > { %p561_p1 = por %p560_p12, %p559_p13 }
  0x21   : > { %p562_p2 = pnand %p561_p1, %p555_p7 }
  0x23   : > { %565 = shalt.err (!%p562_p2)
}
  0x24   : > { %s566_s6 = scalar_lea.vmem %s767_s13, 128  ;;  %s665_s7 = smov [#allocation3]  }
  0x25   : > { %p567_p3 = scmp.ne.s32.totalorder %s767_s13, %s566_s6  ;;  %s571_s8 = sshll.u32 %s665_s7, 4  ;;  %s572_s8 = int_to_ptr.vmem [resolvable:$false] %s571_s8 }
  0x26   : > { %s573_s9 = scalar_lea.vmem %s572_s8, 256  ;;  %p574_p9 = scmp.lt.s32.totalorder %s767_s13, %s572_s8 }
  0x27   : > { %p569_p6 = pnand %p567_p3, %p553_p5  ;;  %p575_p4 = scmp.lt.s32.totalorder %s573_s9, %s566_s6 }
  0x29   : > { %p570_p11 = pneg %p569_p6  ;;  %p576_p10 = por %p575_p4, %p574_p9 }
  0x2b   : > { %p577_p12 = pnand %p576_p10, %p570_p11 }
  0x2d   : > { %580 = shalt.err (!%p577_p12)
}
  0x2e   : > { %484 = dma.hbm_to_vmem [thread:$0]  (!%p771_p0), %s765_s11, 128, %s767_s13, %s184_s15  }
  0x2f   : > { %p895_p1 = scmp.lt.s32.totalorder %s663_s22, 3  ;;  %p896_p2 = scmp.ge.s32.totalorder %s663_s22, 1 }
  0x31   : > { %p216_p5 = pnand %p896_p2, %p895_p1 }
  0x32   : > { %s807_s10 = sand.u32 (!%p216_p5), 1, %s647_s18  }
  0x33   : > { %219 = sbr.rel (%p216_p5) target bundleno = 254 (0xfe), region = 36  ;;  %s463_s12 = sshll.u32 (!%p216_p5), %s807_s10, 3 }
  0x34   : > { %s222_s16 = scalar_lea.sflag (!%p216_p5), [#allocation4], %s807_s10  ;;  %s811_s1 = scalar_lea.vmem (!%p216_p5), [#allocation3], %s463_s12 }
  0x3a   : > { %634 = dma.done.wait (%p743_p8), %s222_s16, 128  }
  0x3b   : > { %636 = vsyncadd (%p743_p8), %s222_s16, 4294967168  ;;  %v666_v0 = vmov 0   ;;  %v273_v1 = vld [vmem:[%s884_s0] sm:$0xf]  ;;  %p261_p9 = scmp.lt.s32.totalorder %s655_s20, 1  ;;  %vm284_vm0 = vcmask 1043456  }
  0x3c   : > { %540 = vset.pattern.permute.xlu0 %v666_v0  ;;  %s299_s28 = sld [smem:[#allocation2]]  ;;  %s464_s27 = sshll.u32 %s807_s10, 4  ;;  %v271_v30 = vld [vmem:[%s811_s1] sm:$0xff] }
  0x3d   : > { %276 = vperm.xlu0 %540, %v273_v1   ;;  %s262_s14 = scalar_select %p261_p9, %s655_s20, 1  ;;  %v318_v36 = vcombine.high %v271_v30, %v271_v30 }
  0x3e   : > { %s476_s6 = sshll.u32 %s655_s20, 8  ;;  %s258_s7 = scalar_lea.vmem [#allocation6], %s464_s27 }
  0x3f   : > { %s475_s15 = sshll.u32 %s262_s14, 3  ;;  %s353_s8 = sshll.u32 %s258_s7, 4  ;;  %s836_s8 = int_to_ptr.vmem [resolvable:$true] %s353_s8 }
  0x40   : > { %s268_s26 = scalar_lea.vmem %s887_s3, %s475_s15  ;;  %s834_s16 = scalar_lea.hbm %s888_s4, %s476_s6 }
  0x41   : > { %v272_v2 = vld [vmem:[%s268_s26] sm:$0xff]  ;;  %s337_s20 = scalar_lea.sflag [#allocation5], %s807_s10  ;;  %s581_s1 = scalar_lea.vmem %s836_s8, 256 }
  0x42   : > { %v280_v3 = vcombine.high %v272_v2, %v272_v2  ;;  %v300_v19 = vstv %s299_s28  ;;  %p582_p8 = scmp.ne.s32.totalorder %s836_s8, %s581_s1  ;;  %p897_p11 = scmp.ne.s32.totalorder %s892_s29, 0 }
  0x43   : > { %s667_s11 = smov [#allocation6]  }
  0x44   : > { %p583_p0 = pnand %p582_p8, %p897_p11  ;;  %s585_s13 = sshll.u32 %s667_s11, 4  ;;  %s586_s13 = int_to_ptr.vmem [resolvable:$false] %s585_s13 }
  0x45   : > { %s587_s14 = scalar_lea.vmem %s586_s13, 512  ;;  %p588_p13 = scmp.lt.s32.totalorder %s836_s8, %s586_s13 }
  0x46   : > { %p584_p7 = pneg %p583_p0  ;;  %p589_p3 = scmp.lt.s32.totalorder %s587_s14, %s581_s1 }
  0x48   : > { %p590_p6 = por %p589_p3, %p588_p13 }
  0x4a   : > { %p591_p4 = pnand %p590_p6, %p584_p7 }
  0xbc   : > { %v277_v4 = vpop.permute.xlu0 %276 }
  0xbd   : > { %v282_v5 = vmul.f32 %v277_v4, %v272_v2  ;;  %v283_v6 = vmul.f32 %v280_v3, %v277_v4 }
  0xbf   : > { %v285_v7 = vsel %vm284_vm0, %v282_v5, 0.0  ;;  %v292_v8 = vsel %vm284_vm0, %v283_v6, 0.0 }
  0xc0   : > { %v286_v9 = vrot.slane %v285_v7, 4  ;;  %v293_v10 = vrot.slane %v292_v8, 4 }
  0xc2   : > { %v287_v11 = vadd.f32 %v286_v9, %v285_v7  ;;  %v294_v12 = vadd.f32 %v293_v10, %v292_v8 }
  0xc4   : > { %v288_v13 = vrot.slane %v287_v11, 2  ;;  %v295_v14 = vrot.slane %v294_v12, 2 }
  0xc6   : > { %v289_v15 = vadd.f32 %v288_v13, %v287_v11  ;;  %v296_v16 = vadd.f32 %v295_v14, %v294_v12 }
  0xc8   : > { %v290_v17 = vrot.slane %v289_v15, 1  ;;  %v297_v18 = vrot.slane %v296_v16, 1 }
  0xca   : > { %v291_v20 = vadd.f32 %v290_v17, %v289_v15  ;;  %v298_v21 = vadd.f32 %v297_v18, %v296_v16 }
  0xcc   : > { %v301_v22 = vadd.f32 %v300_v19, %v291_v20  ;;  %v302_v23 = vadd.f32 %v300_v19, %v298_v21 }
  0xce   : > { %v467_v24 = vmul.f32 -1.442695, %v301_v22  ;;  %v468_v25 = vmul.f32 -1.442695, %v302_v23 }
  0xd0   : > { %543 = vpow2.f32 %v467_v24 }
  0xd1   : > { %545 = vpow2.f32 %v468_v25 }
  0xda   : > { %v544_v26 = vpop.eup %543 }
  0xdb   : > { %v546_v27 = vpop.eup %545  ;;  %v309_v28 = vadd.f32 1.0, %v544_v26 }
  0xdc   : > { %v310_v29 = vadd.f32 1.0, %v546_v27 }
  0xdd   : > { %547 = vrcp.f32 %v309_v28 }
  0xde   : > { %549 = vrcp.f32 %v310_v29 }
  0xe7   : > { %v548_v31 = vpop.eup %547 }
  0xe8   : > { %v550_v32 = vpop.eup %549  ;;  %v315_v33 = vsub.f32 1.0, %v548_v31  ;;  %v322_v34 = vadd.f32 1.0, %v548_v31 }
  0xe9   : > { %v316_v35 = vsub.f32 1.0, %v550_v32  ;;  %v323_v37 = vadd.f32 1.0, %v550_v32 }
  0xea   : > { %v324_v38 = vmul.f32 %v322_v34, %v272_v2  ;;  %v320_v40 = vmul.f32 %v315_v33, %v271_v30 }
  0xeb   : > { %v325_v39 = vmul.f32 %v323_v37, %v280_v3  ;;  %v321_v42 = vmul.f32 %v318_v36, %v316_v35 }
  0xec   : > { %v328_v41 = vrot.slane %v324_v38, 4 }
  0xed   : > { %v329_v43 = vrot.slane %v325_v39, 4 }
  0xee   : > { %v332_v44 = vsel %vm284_vm0, %v320_v40, %v328_v41 }
  0xef   : > { %v333_v45 = vsel %vm284_vm0, %v321_v42, %v329_v43  ;;  %334 = vst [vmem:[%s258_s7] sm:$0xff] %v332_v44 }
  0xf0   : > { %335 = vst [vmem:[%s258_s7 + $0x8] sm:$0xff] %v333_v45 }
  0xf1   : > { %594 = shalt.err (!%p591_p4)
}
  0xf2   : > { %s595_s10 = scalar_lea.hbm %s834_s16, 256  ;;  %s599_s25 = scalar_lea.hbm %s888_s4, 512 }
  0xf3   : > { %p596_p10 = scmp.ne.s32.totalorder %s834_s16, %s595_s10  ;;  %p600_p2 = scmp.lt.u32.totalorder %s834_s16, %s888_s4 }
  0xf4   : > { %p601_p5 = scmp.lt.u32.totalorder %s599_s25, %s595_s10  ;;  %p603_p8 = scmp.lt.u32.totalorder %s595_s10, %s834_s16 }
  0xf5   : > { %p597_p12 = pnand %p596_p10, %p897_p11 }
  0xf6   : > { %p602_p9 = por %p601_p5, %p600_p2 }
  0xf7   : > { %p598_p1 = pneg %p597_p12 }
  0xf8   : > { %p604_p0 = por %p603_p8, %p602_p9 }
  0xfa   : > { %p605_p7 = pnand %p604_p0, %p598_p1 }
  0xfc   : > { %608 = shalt.err (!%p605_p7)
}
  0xfd   : > { %479 = dma.vmem_to_hbm [thread:$0]  (%p897_p11), %s836_s8, 256, %s834_s16, %s337_s20  }
  0xfe PF: > { %s365_s27 = sand.u32 1, %s643_s17   ;;  %p898_p13 = scmp.ne.s32.totalorder %s893_s5, 0 }
  0xff   : > { %p899_p3 = scmp.ge.s32.totalorder %s663_s22, 2  ;;  %s366_s6 = scalar_lea.sflag [#allocation5], %s365_s27 }
 0x101   : > { %p486_p6 = pnand %p899_p3, %p898_p13 }
 0x103   : > { %638 = dma.done.wait (!%p486_p6), %s366_s6, 256  }
 0x104   : > { %640 = vsyncadd (!%p486_p6), %s366_s6, 4294967040  ;;  %s21_s22 = sadd.s32 1, %s663_s22   ;;  %s900_s17 = smov %s647_s18 }
 0x105   : > { %p18_p4 = scmp.ge.s32.totalorder %s21_s22, 4   ;;  %s901_s18 = smov %s651_s19 }
 0x106   : > { %s902_s19 = smov %s752_s30  ;;  %s903_s20 = smov %s659_s21 }
 0x107   : > { %s904_s21 = smov %s906_s24  ;;  %20 = sbr.rel (!%p18_p4) target bundleno = 8 (0x8), region = 84 }
 0x10e   :  { %371 = vsyncpa [#allocation4], 1 }
 0x10f   :  { %373 = vsyncpa [#allocation4 + $0x1], 1 }
 0x110   :  { %374 = vsyncpa [#allocation5], 1 }
 0x111   :  { %376 = vsyncpa [#allocation5 + $0x1], 1 }

</bundles_post_ra>
